<compile_context>
chip_gen: v5e
topology: v5e:2x2
jax: 0.10.0
libtpu: 0.0.40
codegen_flags: <defaults>
</compile_context>

<pallas_src>
import functools
import math

import jax
import jax.numpy as jnp
import numpy as np
from jax.experimental import pallas as pl
from jax.experimental.pallas import tpu as pltpu


# ---------------------------------------------------------------------------
# Kernel
# ---------------------------------------------------------------------------
def _ln_kernel(widx_ref, x_ref, w_ref, b_ref, o_ref, *, eps, hidden, groups):
    """LayerNorm of `groups` logical rows packed side-by-side on the lane axis.

    widx_ref : (grid,) int32 in SMEM — consumed only by the weight/bias
               index_maps (selects node vs. edge parameters per tile).
    x_ref    : (tile_rows, groups*hidden) input tile.
    w_ref    : (1, 1, groups*hidden) affine scale (already tiled `groups`x).
    b_ref    : (1, 1, groups*hidden) affine shift.
    o_ref    : (tile_rows, groups*hidden) output tile — one lane-dense store.
    """
    del widx_ref  # used only by the index_maps
    x = x_ref[...].astype(jnp.float32)
    inv_h = 1.0 / float(hidden)

    def _norm(seg):
        # Two-pass statistics (numerically stable, matches torch LayerNorm).
        mean = jnp.sum(seg, axis=-1, keepdims=True) * inv_h
        d = seg - mean
        var = jnp.sum(d * d, axis=-1, keepdims=True) * inv_h
        return d * jax.lax.rsqrt(var + eps)

    if groups == 1:
        y = _norm(x)
    else:
        # Static unroll over the lane segments; pieces are reassembled into one
        # full-width value so the output store / DMA stays unmasked.
        y = jnp.concatenate(
            [_norm(x[:, s * hidden:(s + 1) * hidden]) for s in range(groups)],
            axis=-1)

    w = w_ref[0].astype(jnp.float32)   # (1, groups*hidden), broadcasts over rows
    b = b_ref[0].astype(jnp.float32)
    o_ref[...] = (y * w + b).astype(o_ref.dtype)


# ---------------------------------------------------------------------------
# Wrapper
# ---------------------------------------------------------------------------
def _round_up(x, m):
    return (x + m - 1) // m * m


def _pack_groups(hidden, max_lane_width=1024):
    """How many logical rows to fold into one lane-dense (multiple-of-128) row."""
    if hidden % 128 == 0:
        return 1
    g = math.lcm(hidden, 128) // hidden
    return g if g * hidden <= max_lane_width else 1


def _layernorm_many(xs, weights, biases, *, eps=1e-5,
                    block_bytes=6 * 1024 * 1024):
    """LayerNorm over the last axis of every array in `xs` with ONE pallas_call.

    xs[i] is normalized with (weights[i], biases[i]); a scalar-prefetched
    per-tile index selects the parameter row, letting LayerNormGraph's node and
    edge norms share a single kernel dispatch.
    """
    assert xs and len(xs) == len(weights) == len(biases)
    hidden = xs[0].shape[-1]
    dtype = xs[0].dtype
    for x in xs:
        assert x.shape[-1] == hidden and x.dtype == dtype

    n = len(xs)
    g = _pack_groups(hidden)
    lane_w = g * hidden
    itemsize = jnp.dtype(dtype).itemsize
    mult = 8 if itemsize >= 4 else (16 if itemsize == 2 else 32)  # sublane pack

    # Flatten leading dims, pad rows to a multiple of g (pad rows are sliced
    # off afterwards), then fold g rows into one lane-dense row.
    flats, rows_list, p_rows_list = [], [], []
    for x in xs:
        f = x.reshape(-1, hidden)
        r = f.shape[0]
        gr = _round_up(r, g)
        if gr != r:
            f = jnp.pad(f, ((0, gr - r), (0, 0)))
        flats.append(f.reshape(gr // g, lane_w))
        rows_list.append(r)
        p_rows_list.append(gr // g)

    # Row-tile sizing: ~block_bytes per tile (2x in + 2x out double-buffering
    # ~= 4*block_bytes, under the 48 MiB scoped limit and v7x's 64 MiB VMEM),
    # capped at ~half the total work so the grid has >= 2 steps and both v7x
    # TensorCores are used (free on single-core v5e/v6e).
    row_bytes = lane_w * itemsize
    tile_rows = max(mult, (block_bytes // row_bytes) // mult * mult)
    total_p = sum(p_rows_list)
    tile_rows = min(tile_rows, max(mult, _round_up(pl.cdiv(total_p, 2), mult)))

    # All tensors except the last are padded to a tile multiple so every grid
    # step touches exactly one tensor.  The last tensor may end in a partial
    # block: Pallas reads garbage rows there and discards their writes, which
    # is harmless because each row's LayerNorm is independent.
    tiles_list, padded = [], []
    for idx, f in enumerate(flats):
        p = p_rows_list[idx]
        t = int(pl.cdiv(p, tile_rows))
        tiles_list.append(t)
        if idx != n - 1:
            tp = t * tile_rows
            if tp != p:
                f = jnp.pad(f, ((0, tp - p), (0, 0)))
        padded.append(f)
    x_all = padded[0] if n == 1 else jnp.concatenate(padded, axis=0)
    total_rows = x_all.shape[0]
    total_tiles = int(sum(tiles_list))

    # Per-grid-step parameter-row selector (scalar-prefetched into SMEM).
    widx = jnp.asarray(np.concatenate(
        [np.full((t,), i, dtype=np.int32) for i, t in enumerate(tiles_list)]))

    # Stacked, g-tiled affine parameters: (n, 1, lane_w).  The trailing block
    # equals the full trailing dims; the tiny DMA only re-fires when widx[i]
    # changes, so parameters effectively stay VMEM-resident per tensor.
    w_stack = jnp.stack([jnp.tile(w.reshape(1, hidden), (1, g)) for w in weights])
    b_stack = jnp.stack([jnp.tile(b.reshape(1, hidden), (1, g)) for b in biases])

    kernel = functools.partial(_ln_kernel, eps=eps, hidden=hidden, groups=g)

    out = pl.pallas_call(
        kernel,
        out_shape=jax.ShapeDtypeStruct((total_rows, lane_w), dtype),
        grid_spec=pltpu.PrefetchScalarGridSpec(
            num_scalar_prefetch=1,
            grid=(total_tiles,),
            in_specs=[
                pl.BlockSpec((tile_rows, lane_w), lambda i, widx: (i, 0)),
                pl.BlockSpec((1, 1, lane_w), lambda i, widx: (widx[i], 0, 0)),
                pl.BlockSpec((1, 1, lane_w), lambda i, widx: (widx[i], 0, 0)),
            ],
            out_specs=pl.BlockSpec((tile_rows, lane_w), lambda i, widx: (i, 0)),
        ),
        compiler_params=pltpu.CompilerParams(
            dimension_semantics=("parallel",),      # megacore sharding on v7x
            vmem_limit_bytes=48 * 1024 * 1024,      # explicit, v7x-safe
        ),
    )(widx, x_all, w_stack, b_stack)

    # Un-concatenate, un-pack, strip padding.
    outs, start = [], 0
    for idx, x in enumerate(xs):
        p = p_rows_list[idx]
        r = rows_list[idx]
        y = out[start:start + p].reshape(p * g, hidden)[:r].reshape(x.shape)
        start += tiles_list[idx] * tile_rows if idx != n - 1 else p
        outs.append(y)
    return outs


def pallas_layernorm(x, weight, bias, *, eps=1e-5, block_bytes=6 * 1024 * 1024):
    """torch.nn.LayerNorm(hidden)-equivalent over the last axis of x."""
    (y,) = _layernorm_many([x], [weight], [bias], eps=eps, block_bytes=block_bytes)
    return y


class LayerNormGraphPallas:
    """JAX/Pallas equivalent of LayerNormGraph: independent LayerNorms for
    node features and edge features over the hidden (last) dimension."""

    # Below this total size the two norms share one pallas_call (dispatch and
    # pipeline prologue dominate tiny graph tensors); above it the wrapper-side
    # concatenate would cost more HBM traffic than a second dispatch saves.
    _FUSE_BYTES = 8 * 1024 * 1024

    def __init__(self, hidden_size: int, eps: float = 1e-5):
        self.hidden_size = hidden_size
        self.eps = eps
        # torch.nn.LayerNorm default init: weight=1, bias=0 (one set per norm).
        self.node_weight = jnp.ones((hidden_size,), jnp.float32)
        self.node_bias = jnp.zeros((hidden_size,), jnp.float32)
        self.edge_weight = jnp.ones((hidden_size,), jnp.float32)
        self.edge_bias = jnp.zeros((hidden_size,), jnp.float32)

    def __call__(self, node_features, edge_features):
        nbytes = (node_features.size + edge_features.size) * \
            jnp.dtype(node_features.dtype).itemsize
        if (node_features.dtype == edge_features.dtype
                and nbytes <= self._FUSE_BYTES):
            node_out, edge_out = _layernorm_many(
                [node_features, edge_features],
                [self.node_weight, self.edge_weight],
                [self.node_bias, self.edge_bias],
                eps=self.eps)
        else:
            node_out = pallas_layernorm(node_features, self.node_weight,
                                        self.node_bias, eps=self.eps)
            edge_out = pallas_layernorm(edge_features, self.edge_weight,
                                        self.edge_bias, eps=self.eps)
        return node_out, edge_out


def _reference_layernorm(x, w, b, eps=1e-5):
    x32 = x.astype(jnp.float32)
    mean = jnp.mean(x32, axis=-1, keepdims=True)
    var = jnp.mean((x32 - mean) ** 2, axis=-1, keepdims=True)
    return ((x32 - mean) * jax.lax.rsqrt(var + eps) * w + b).astype(x.dtype)


if __name__ == "__main__":
    hidden = 32
    key = jax.random.PRNGKey(0)
    k_node, k_edge, k1, k2, k3, k4, k5, k6 = jax.random.split(key, 8)

    # --- LayerNormGraph forward: node (2,16,32), edge (24,32), fused call ----
    node_features = jax.random.normal(k_node, (2, 16, hidden), jnp.float32)
    edge_features = jax.random.normal(k_edge, (24, hidden), jnp.float32)
    model = LayerNormGraphPallas(hidden)
    node_out, edge_out = model(node_features, edge_features)
    jax.block_until_ready((node_out, edge_out))
    assert node_out.shape == node_features.shape
    assert edge_out.shape == edge_features.shape
    assert jnp.allclose(node_out, _reference_layernorm(
        node_features, model.node_weight, model.node_bias), atol=1e-5, rtol=1e-5)
    assert jnp.allclose(edge_out, _reference_layernorm(
        edge_features, model.edge_weight, model.edge_bias), atol=1e-5, rtol=1e-5)

    # --- Distinct node/edge params + mean-shifted data: exercises per-tile
    #     weight routing, tile/row padding, multi-tile grid, and the two-pass
    #     variance, all on the fused path. ----------------------------------
    model2 = LayerNormGraphPallas(hidden)
    model2.node_weight = 1.0 + 0.1 * jax.random.normal(k1, (hidden,), jnp.float32)
    model2.node_bias = 0.1 * jax.random.normal(k2, (hidden,), jnp.float32)
    model2.edge_weight = 1.0 - 0.1 * jax.random.normal(k3, (hidden,), jnp.float32)
    model2.edge_bias = -0.1 * jax.random.normal(k4, (hidden,), jnp.float32)
    node2 = 3.0 + jax.random.normal(k5, (5, hidden), jnp.float32)
    edge2 = -2.0 + jax.random.normal(k6, (50, hidden), jnp.float32)
    n2, e2 = model2(node2, edge2)
    jax.block_until_ready((n2, e2))
    assert jnp.allclose(n2, _reference_layernorm(
        node2, model2.node_weight, model2.node_bias), atol=1e-5, rtol=1e-5)
    assert jnp.allclose(e2, _reference_layernorm(
        edge2, model2.edge_weight, model2.edge_bias), atol=1e-5, rtol=1e-5)

    # --- Generalized lane packing: hidden=48 -> g=8 (row padding required). --
    h48 = 48
    x48 = jax.random.normal(k1, (10, h48), jnp.float32)
    w48 = 1.0 + 0.05 * jax.random.normal(k2, (h48,), jnp.float32)
    b48 = 0.05 * jax.random.normal(k3, (h48,), jnp.float32)
    y48 = pallas_layernorm(x48, w48, b48)
    jax.block_until_ready(y48)
    assert jnp.allclose(y48, _reference_layernorm(x48, w48, b48),
                        atol=1e-5, rtol=1e-5)

    # --- Unpacked fallback path: hidden=200 (packed lane width would be huge).
    h200 = 200
    x200 = jax.random.normal(k4, (10, h200), jnp.float32)
    w200 = jnp.ones((h200,), jnp.float32)
    b200 = jnp.zeros((h200,), jnp.float32)
    y200 = pallas_layernorm(x200, w200, b200)
    jax.block_until_ready(y200)
    assert jnp.allclose(y200, _reference_layernorm(x200, w200, b200),
                        atol=1e-5, rtol=1e-5)

    print("KERNEL_OK")
</pallas_src>

<mosaic_0001>
module attributes {stable_mosaic.version = 11 : i64} {
  func.func @_ln_kernel(%arg0: i32, %arg1: memref<2xi32, #tpu.memory_space<smem>>, %arg2: memref<8x128xf32, #tpu.memory_space<vmem>>, %arg3: memref<1x1x128xf32, #tpu.memory_space<vmem>>, %arg4: memref<1x1x128xf32, #tpu.memory_space<vmem>>, %arg5: memref<8x128xf32, #tpu.memory_space<vmem>>) attributes {dimension_semantics = [#tpu.dimension_semantics<parallel>], iteration_bounds = array<i64: 2>, scalar_prefetch = 1 : i64, scratch_operands = 0 : i64, tpu.core_type = #tpu.core_type<tc>, window_params = [{transform_indices = @transform_0, window_bounds = array<i64: 8, 128>}, {transform_indices = @transform_1, window_bounds = array<i64: 1, 1, 128>}, {transform_indices = @transform_2, window_bounds = array<i64: 1, 1, 128>}, {transform_indices = @transform_3, window_bounds = array<i64: 8, 128>}]} {
    %c0 = arith.constant 0 : index
    %c0_0 = arith.constant 0 : index
    %0 = vector.load %arg2[%c0, %c0_0] : memref<8x128xf32, #tpu.memory_space<vmem>>, vector<8x128xf32>
    %1 = vector.extract_strided_slice %0 {offsets = [0, 0], sizes = [8, 32], strides = [1, 1]} : vector<8x128xf32> to vector<8x32xf32>
    %cst = arith.constant dense<0.000000e+00> : vector<8xf32>
    %2 = vector.multi_reduction <add>, %1, %cst [1] : vector<8x32xf32> to vector<8xf32>
    %3 = vector.shape_cast %2 : vector<8xf32> to vector<8x1xf32>
    %cst_1 = arith.constant 3.125000e-02 : f32
    %4 = vector.broadcast %cst_1 : f32 to vector<8x1xf32>
    %5 = arith.mulf %3, %4 : vector<8x1xf32>
    %6 = vector.broadcast %5 : vector<8x1xf32> to vector<8x32xf32>
    %7 = arith.subf %1, %6 : vector<8x32xf32>
    %8 = arith.mulf %7, %7 : vector<8x32xf32>
    %cst_2 = arith.constant dense<0.000000e+00> : vector<8xf32>
    %9 = vector.multi_reduction <add>, %8, %cst_2 [1] : vector<8x32xf32> to vector<8xf32>
    %10 = vector.shape_cast %9 : vector<8xf32> to vector<8x1xf32>
    %cst_3 = arith.constant 3.125000e-02 : f32
    %11 = vector.broadcast %cst_3 : f32 to vector<8x1xf32>
    %12 = arith.mulf %10, %11 : vector<8x1xf32>
    %cst_4 = arith.constant 9.99999974E-6 : f32
    %13 = vector.broadcast %cst_4 : f32 to vector<8x1xf32>
    %14 = arith.addf %12, %13 : vector<8x1xf32>
    %15 = math.rsqrt %14 : vector<8x1xf32>
    %16 = vector.broadcast %15 : vector<8x1xf32> to vector<8x32xf32>
    %17 = arith.mulf %7, %16 : vector<8x32xf32>
    %18 = vector.extract_strided_slice %0 {offsets = [0, 32], sizes = [8, 32], strides = [1, 1]} : vector<8x128xf32> to vector<8x32xf32>
    %cst_5 = arith.constant dense<0.000000e+00> : vector<8xf32>
    %19 = vector.multi_reduction <add>, %18, %cst_5 [1] : vector<8x32xf32> to vector<8xf32>
    %20 = vector.shape_cast %19 : vector<8xf32> to vector<8x1xf32>
    %cst_6 = arith.constant 3.125000e-02 : f32
    %21 = vector.broadcast %cst_6 : f32 to vector<8x1xf32>
    %22 = arith.mulf %20, %21 : vector<8x1xf32>
    %23 = vector.broadcast %22 : vector<8x1xf32> to vector<8x32xf32>
    %24 = arith.subf %18, %23 : vector<8x32xf32>
    %25 = arith.mulf %24, %24 : vector<8x32xf32>
    %cst_7 = arith.constant dense<0.000000e+00> : vector<8xf32>
    %26 = vector.multi_reduction <add>, %25, %cst_7 [1] : vector<8x32xf32> to vector<8xf32>
    %27 = vector.shape_cast %26 : vector<8xf32> to vector<8x1xf32>
    %cst_8 = arith.constant 3.125000e-02 : f32
    %28 = vector.broadcast %cst_8 : f32 to vector<8x1xf32>
    %29 = arith.mulf %27, %28 : vector<8x1xf32>
    %cst_9 = arith.constant 9.99999974E-6 : f32
    %30 = vector.broadcast %cst_9 : f32 to vector<8x1xf32>
    %31 = arith.addf %29, %30 : vector<8x1xf32>
    %32 = math.rsqrt %31 : vector<8x1xf32>
    %33 = vector.broadcast %32 : vector<8x1xf32> to vector<8x32xf32>
    %34 = arith.mulf %24, %33 : vector<8x32xf32>
    %35 = vector.extract_strided_slice %0 {offsets = [0, 64], sizes = [8, 32], strides = [1, 1]} : vector<8x128xf32> to vector<8x32xf32>
    %cst_10 = arith.constant dense<0.000000e+00> : vector<8xf32>
    %36 = vector.multi_reduction <add>, %35, %cst_10 [1] : vector<8x32xf32> to vector<8xf32>
    %37 = vector.shape_cast %36 : vector<8xf32> to vector<8x1xf32>
    %cst_11 = arith.constant 3.125000e-02 : f32
    %38 = vector.broadcast %cst_11 : f32 to vector<8x1xf32>
    %39 = arith.mulf %37, %38 : vector<8x1xf32>
    %40 = vector.broadcast %39 : vector<8x1xf32> to vector<8x32xf32>
    %41 = arith.subf %35, %40 : vector<8x32xf32>
    %42 = arith.mulf %41, %41 : vector<8x32xf32>
    %cst_12 = arith.constant dense<0.000000e+00> : vector<8xf32>
    %43 = vector.multi_reduction <add>, %42, %cst_12 [1] : vector<8x32xf32> to vector<8xf32>
    %44 = vector.shape_cast %43 : vector<8xf32> to vector<8x1xf32>
    %cst_13 = arith.constant 3.125000e-02 : f32
    %45 = vector.broadcast %cst_13 : f32 to vector<8x1xf32>
    %46 = arith.mulf %44, %45 : vector<8x1xf32>
    %cst_14 = arith.constant 9.99999974E-6 : f32
    %47 = vector.broadcast %cst_14 : f32 to vector<8x1xf32>
    %48 = arith.addf %46, %47 : vector<8x1xf32>
    %49 = math.rsqrt %48 : vector<8x1xf32>
    %50 = vector.broadcast %49 : vector<8x1xf32> to vector<8x32xf32>
    %51 = arith.mulf %41, %50 : vector<8x32xf32>
    %52 = vector.extract_strided_slice %0 {offsets = [0, 96], sizes = [8, 32], strides = [1, 1]} : vector<8x128xf32> to vector<8x32xf32>
    %cst_15 = arith.constant dense<0.000000e+00> : vector<8xf32>
    %53 = vector.multi_reduction <add>, %52, %cst_15 [1] : vector<8x32xf32> to vector<8xf32>
    %54 = vector.shape_cast %53 : vector<8xf32> to vector<8x1xf32>
    %cst_16 = arith.constant 3.125000e-02 : f32
    %55 = vector.broadcast %cst_16 : f32 to vector<8x1xf32>
    %56 = arith.mulf %54, %55 : vector<8x1xf32>
    %57 = vector.broadcast %56 : vector<8x1xf32> to vector<8x32xf32>
    %58 = arith.subf %52, %57 : vector<8x32xf32>
    %59 = arith.mulf %58, %58 : vector<8x32xf32>
    %cst_17 = arith.constant dense<0.000000e+00> : vector<8xf32>
    %60 = vector.multi_reduction <add>, %59, %cst_17 [1] : vector<8x32xf32> to vector<8xf32>
    %61 = vector.shape_cast %60 : vector<8xf32> to vector<8x1xf32>
    %cst_18 = arith.constant 3.125000e-02 : f32
    %62 = vector.broadcast %cst_18 : f32 to vector<8x1xf32>
    %63 = arith.mulf %61, %62 : vector<8x1xf32>
    %cst_19 = arith.constant 9.99999974E-6 : f32
    %64 = vector.broadcast %cst_19 : f32 to vector<8x1xf32>
    %65 = arith.addf %63, %64 : vector<8x1xf32>
    %66 = math.rsqrt %65 : vector<8x1xf32>
    %67 = vector.broadcast %66 : vector<8x1xf32> to vector<8x32xf32>
    %68 = arith.mulf %58, %67 : vector<8x32xf32>
    %69 = tpu.concatenate %17, %34, %51, %68 in 1 : vector<8x32xf32>, vector<8x32xf32>, vector<8x32xf32>, vector<8x32xf32> -> vector<8x128xf32>
    %c0_20 = arith.constant 0 : index
    %c0_21 = arith.constant 0 : index
    %c0_22 = arith.constant 0 : index
    %70 = vector.load %arg3[%c0_20, %c0_21, %c0_22] : memref<1x1x128xf32, #tpu.memory_space<vmem>>, vector<1x1x128xf32>
    %71 = vector.shape_cast %70 : vector<1x1x128xf32> to vector<1x128xf32>
    %c0_23 = arith.constant 0 : index
    %c0_24 = arith.constant 0 : index
    %c0_25 = arith.constant 0 : index
    %72 = vector.load %arg4[%c0_23, %c0_24, %c0_25] : memref<1x1x128xf32, #tpu.memory_space<vmem>>, vector<1x1x128xf32>
    %73 = vector.shape_cast %72 : vector<1x1x128xf32> to vector<1x128xf32>
    %74 = vector.broadcast %71 : vector<1x128xf32> to vector<8x128xf32>
    %75 = arith.mulf %69, %74 : vector<8x128xf32>
    %76 = vector.broadcast %73 : vector<1x128xf32> to vector<8x128xf32>
    %77 = arith.addf %75, %76 : vector<8x128xf32>
    %c0_26 = arith.constant 0 : index
    %c0_27 = arith.constant 0 : index
    %78 = vector.load %arg5[%c0_26, %c0_27] : memref<8x128xf32, #tpu.memory_space<vmem>>, vector<8x128xf32>
    tpu.vector_store %arg5[%c0_26, %c0_27], %77 {strides = array<i32>} : memref<8x128xf32, #tpu.memory_space<vmem>>, vector<8x128xf32>,
    return
  }
  func.func @transform_0(%arg0: i32, %arg1: memref<2xi32, #tpu.memory_space<smem>>) -> (i32, i32) {
    %c0_i32 = arith.constant 0 : i32
    %c0_i32_0 = arith.constant 0 : i32
    return %arg0, %c0_i32 : i32, i32
  }
  func.func @transform_1(%arg0: i32, %arg1: memref<2xi32, #tpu.memory_space<smem>>) -> (i32, i32, i32) {
    %0 = arith.index_cast %arg0 : i32 to index
    %1 = memref.load %arg1[%0] : memref<2xi32, #tpu.memory_space<smem>>
    %c0_i32 = arith.constant 0 : i32
    %c0_i32_0 = arith.constant 0 : i32
    %c0_i32_1 = arith.constant 0 : i32
    return %1, %c0_i32, %c0_i32_0 : i32, i32, i32
  }
  func.func @transform_2(%arg0: i32, %arg1: memref<2xi32, #tpu.memory_space<smem>>) -> (i32, i32, i32) {
    %0 = arith.index_cast %arg0 : i32 to index
    %1 = memref.load %arg1[%0] : memref<2xi32, #tpu.memory_space<smem>>
    %c0_i32 = arith.constant 0 : i32
    %c0_i32_0 = arith.constant 0 : i32
    %c0_i32_1 = arith.constant 0 : i32
    return %1, %c0_i32, %c0_i32_0 : i32, i32, i32
  }
  func.func @transform_3(%arg0: i32, %arg1: memref<2xi32, #tpu.memory_space<smem>>) -> (i32, i32) {
    %c0_i32 = arith.constant 0 : i32
    %c0_i32_0 = arith.constant 0 : i32
    return %arg0, %c0_i32 : i32, i32
  }
}

</mosaic_0001>

<bundles_post_ra>
// kernel: tpu_custom_call.1
= control target key start
LH: loop header
LB: loop body
LE: loop exit
PB: predicated region body
PF: predicated region fallthrough
CT: control target
= control target key end

     0   :  { %s774_s18 = smov [#allocation3]   ;;  %s1076_s0 = inlined_call_operand.hbm [shape: s32[2], index: 0, kind: input, shape index: {}]   ;;  %s1077_s1 = inlined_call_operand.hbm [shape: f32[14,128], index: 1, kind: input, shape index: {}]   ;;  %s1078_s2 = inlined_call_operand.hbm [shape: f32[2,1,128], index: 2, kind: input, shape index: {}]   ;;  %s1079_s3 = inlined_call_operand.vmem [shape: f32[2,1,128], index: 3, kind: input, shape index: {}]   ;;  %s1080_s4 = inlined_call_operand.hbm [shape: f32[14,128], index: 4, kind: output, shape index: {}]  }
   0x1   :  { %1085 = sst [smem:[#allocation19_spill]] %s1077_s1  ;;  %s10_s17 = sshll.u32 %s1076_s0, 4  ;;  %s11_s17 = int_to_ptr.hbm [resolvable:$true] %s10_s17 }
   0x2   :  { %13 = dma.hbm_to_smem %s11_s17, 16, %s774_s18, [#allocation2] }
   0x3   :  { %732 = dma.done.wait [#allocation2], 16 }
   0x4   :  { %733 = vsyncadd [#allocation2], 4294967280 }
   0x5   :  { %16 = sfence }
   0x6   :  { %17 = vsyncpa [#allocation5], 0 }
   0x7   :  { %19 = vsyncpa [#allocation5 + $0x1], 0 }
   0x8   :  { %20 = vsyncpa [#allocation8], 0 }
   0x9   :  { %22 = vsyncpa [#allocation8 + $0x1], 0 }
   0xa   :  { %23 = vsyncpa [#allocation6], 0 }
   0xb   :  { %25 = vsyncpa [#allocation6 + $0x1], 0  ;;  %s806_s19 = smov 0   ;;  %s808_s20 = smov 0  }
   0xc   :  { %s810_s21 = smov 0   ;;  %s812_s22 = smov 0  }
   0xd   :  { %s814_s0 = smov 0   ;;  %s816_s23 = smov 0  }
   0xe   :  { %s818_s24 = smov 0  }
   0xf LB: > { %1086 = sst [smem:[#allocation16_spill]] %s768_s23  ;;  %s842_s25 = sadd.s32 4294967295, %s772_s24   ;;  %s772_s24 = sphi %s818_s24, %s1115_s24   ;;  %s768_s23 = sphi %s816_s23, %s1109_s23   ;;  %s764_s0 = sphi %s814_s0, %s1114_s0   ;;  %s760_s22 = sphi %s812_s22, %s1113_s22   ;;  %s756_s21 = sphi %s810_s21, %s1112_s21   ;;  %s752_s20 = sphi %s808_s20, %s1111_s20   ;;  %s748_s19 = sphi %s806_s19, %s1110_s19  }
  0x10   : > { %s499_s26 = sadd.s32 4294967294, %s772_s24   ;;  %s846_s27 = sadd.s32 1, %s772_s24  }
  0x11   : > { %s38_s28 = sadd.s32 1, %s768_s23  ;;  %s35_s29 = ssub.s32 %s772_s24, %s846_s27 }
  0x12   : > { %p45_p0 = scmp.ne.s32.totalorder %s768_s23, %s764_s0  ;;  %p36_p1 = scmp.eq.s32.totalorder %s35_s29, 0 }
  0x13   : > { %p1083_p2 = scmp.eq.s32.totalorder %s772_s24, 0  ;;  %p51_p3 = scmp.ne.s32.totalorder %s764_s0, %s760_s22 }
  0x14   : > { %p1082_p4 = scmp.eq.s32.totalorder %s842_s25, 0  ;;  %s873_s7 = sld [smem:[#allocation3 + %s846_s27]] }
  0x15   : > { %s858_s30 = scalar_select %p36_p1, %s768_s23, %s38_s28  }
  0x16   : > { %p862_p5 = por %p1083_p2, %p45_p0  ;;  %p868_p6 = por %p1082_p4, %p51_p3 }
  0x17   : > { %1087 = sst [smem:[#allocation17_spill]] %s858_s30  ;;  %p131_p7 = scmp.eq.s32.totalorder %s842_s25, 1 }
  0x18   : > { %p137_p8 = scmp.eq.s32.totalorder %s499_s26, 1  ;;  %p1081_p11 = scmp.lt.s32.totalorder %s772_s24, 2 }
  0x19   : > { %p877_p10 = por %p131_p7, %p45_p0  ;;  %s157_s10 = sand.u32 1, %s768_s23  }
  0x1a   : > { %p882_p12 = por %p137_p8, %p51_p3  ;;  %s502_s11 = sshll.u32 %s157_s10, 3 }
  0x1b   : > { %s503_s12 = sshll.u32 %s772_s24, 3  ;;  %s1092_s1 = sld [smem:[#allocation19_spill]] }
  0x1c   : > { %s1091_s9 = scalar_select %p882_p12, 1, 0 }
  0x1d   : > { %s161_s16 = scalar_lea.vmem [#allocation4], %s502_s11  ;;  %p895_p13 = pnand %p1081_p11, %p862_p5 }
  0x1e   : > { %s169_s17 = sshll.u32 %s161_s16, 4  ;;  %p504_p0 = scmp.ge.s32.totalorder %s772_s24, 1  ;;  %s170_s17 = int_to_ptr.vmem [resolvable:$true] %s169_s17 }
  0x1f   : > { %p200_p1 = scmp.lt.s32.totalorder %s772_s24, 3  ;;  %s158_s28 = scalar_lea.sflag [#allocation5], %s157_s10 }
  0x20   : > { %p620_p7 = pneg %p895_p13 }
  0x21   : > { %s165_s15 = scalar_lea.hbm %s1092_s1, %s503_s12  ;;  %s623_s5 = scalar_lea.hbm %s1092_s1, 16 }
  0x22   : > { %s167_s18 = sshll.u32 %s165_s15, 4  ;;  %s168_s18 = int_to_ptr.hbm [resolvable:$true] %s167_s18 }
  0x23   : > { %s616_s29 = sshra.s32 %s168_s18, 4  ;;  %s617_s29 = int_to_ptr.hbm [resolvable:$true] %s616_s29 }
  0x24   : > { %s618_s30 = scalar_lea.hbm %s617_s29, 8  ;;  %p624_p5 = scmp.lt.s32.totalorder %s617_s29, %s1092_s1 }
  0x25   : > { %p619_p3 = scmp.ne.s32.totalorder %s617_s29, %s618_s30  ;;  %p625_p11 = scmp.lt.s32.totalorder %s623_s5, %s618_s30 }
  0x27   : > { %p621_p8 = pnand %p620_p7, %p619_p3  ;;  %p626_p4 = por %p625_p11, %p624_p5 }
  0x29   : > { %p622_p9 = pneg %p621_p8 }
  0x2b   : > { %p627_p2 = pnand %p626_p4, %p622_p9 }
  0x2d   : > { %630 = shalt.err (!%p627_p2)
}
  0x2e   : > { %522 = dma.hbm_to_vmem [thread:$0]  (!%p895_p13), %s168_s18, 128, %s170_s17, %s158_s28  }
  0x2f   : > { %p915_p2 = pnand %p504_p0, %p200_p1  ;;  %s61_s10 = sld [smem:[#allocation3 + %s772_s24]] }
  0x30   : > { %p73_p4 = scmp.ne.s32.totalorder %s756_s21, %s752_s20  ;;  %p79_p9 = scmp.ne.s32.totalorder %s752_s20, %s748_s19 }
  0x31   : > { %p1095_p11 = scmp.eq.s32.totalorder %s772_s24, 0  ;;  %p1096_p7 = scmp.eq.s32.totalorder %s842_s25, 0 }
  0x32   : > { %s66_s17 = sadd.s32 1, %s756_s21  ;;  %s176_s18 = sand.u32 1, %s756_s21  }
  0x33   : > { %p75_p3 = por %p73_p4, %p1095_p11  ;;  %p928_p8 = por %p79_p9, %p1096_p7 }
  0x34   : > { %p1099_p0 = scmp.lt.s32.totalorder %s772_s24, 2  ;;  %s179_s12 = scalar_lea.vmem [#allocation7], %s176_s18 }
  0x35   : > { %s512_s16 = scalar_select %p75_p3, [#allocation3], [#allocation10] }
  0x36   : > { %s63_s26 = ssub.s32 %s61_s10, %s873_s7  ;;  %p1100_p1 = pmov %p1099_p0 }
  0x37   : > { %p64_p13 = scmp.eq.s32.totalorder %s63_s26, 0  ;;  %s1117_s16 = smov (!%p1099_p0, %s512_s16), [#allocation11] }
  0x38   : > { %s513_s28 = scalar_select %p75_p3, %s772_s24, 0 }
  0x39   : > { %s937_s29 = scalar_select %p64_p13, %s756_s21, %s66_s17  }
  0x3a   : > { %s1119_s28 = smov (!%p1100_p1, %s513_s28), 0  ;;  %p1101_p5 = pmov %p1099_p0 }
  0x3b   : > { %1098 = sst [smem:[#allocation18_spill]] %s937_s29  ;;  %s187_s5 = sshll.u32 %s179_s12, 4  ;;  %s188_s5 = int_to_ptr.vmem [resolvable:$true] %s187_s5 }
  0x3c   : > { %p945_p12 = pnand %p1101_p5, %p75_p3  ;;  %s180_s11 = sld [smem:[%s1117_s16 + %s1119_s28]] }
  0x3d   : > { %s177_s26 = scalar_lea.sflag [#allocation8], %s176_s18  ;;  %s653_s28 = scalar_lea.hbm %s1078_s2, 2 }
  0x3e   : > { %p650_p9 = pneg %p945_p12 }
  0x42   : > { %s183_s14 = scalar_lea.hbm %s1078_s2, %s180_s11 }
  0x43   : > { %s185_s10 = sshll.u32 %s183_s14, 4  ;;  %s186_s10 = int_to_ptr.hbm [resolvable:$true] %s185_s10 }
  0x44   : > { %s646_s17 = sshra.s32 %s186_s10, 4  ;;  %s647_s17 = int_to_ptr.hbm [resolvable:$true] %s646_s17 }
  0x45   : > { %s648_s1 = scalar_lea.hbm %s647_s17, 1  ;;  %p654_p7 = scmp.lt.s32.totalorder %s647_s17, %s1078_s2 }
  0x46   : > { %p649_p4 = scmp.ne.s32.totalorder %s647_s17, %s648_s1  ;;  %p655_p13 = scmp.lt.s32.totalorder %s653_s28, %s648_s1 }
  0x48   : > { %p651_p11 = pnand %p650_p9, %p649_p4  ;;  %p656_p0 = por %p655_p13, %p654_p7 }
  0x4a   : > { %p652_p3 = pneg %p651_p11 }
  0x4c   : > { %p657_p1 = pnand %p656_p0, %p652_p3 }
  0x4e   : > { %660 = shalt.err (!%p657_p1)
}
  0x4f   : > { %527 = dma.hbm_to_vmem [thread:$0]  (!%p945_p12), %s186_s10, 16, %s188_s5, %s177_s26  }
  0x50   : > { %204 = sbr.rel (%p915_p2) target bundleno = 584 (0x248), region = 32  ;;  %s965_s18 = sand.u32 (!%p915_p2), 1, %s764_s0  }
  0x51   : > { %s505_s23 = sshll.u32 (!%p915_p2), %s965_s18, 3  ;;  %s207_s29 = scalar_lea.sflag (!%p915_p2), [#allocation5], %s965_s18 }
  0x52   : > { %s210_s1 = scalar_lea.vmem (!%p915_p2), [#allocation4], %s505_s23 }
  0x55   : > { %735 = dma.done.wait (%p868_p6), %s207_s29, 128  }
  0x56   : > { %737 = vsyncadd (%p868_p6), %s207_s29, 4294967168  ;;  %s216_s30 = sand.u32 1, %s752_s20  }
  0x57   : > { %s217_s19 = scalar_lea.sflag [#allocation8], %s216_s30  ;;  %s976_s11 = scalar_lea.vmem [#allocation7], %s216_s30 }
  0x58   : > { %739 = dma.done.wait (%p928_p8), %s217_s19, 16  }
  0x59   : > { %741 = vsyncadd (%p928_p8), %s217_s19, 4294967280  ;;  %v257_v0 = vld [vmem:[%s210_s1] sm:$0xff]  ;;  %s775_s5 = smov 96   ;;  %s776_s7 = smov 32   ;;  %vm258_vm0 = vcmask 261120   ;;  %vm370_vm12 = vcmask 523264  }
  0x5a   : > { %282 = vrot.lane.b32.xlu0 %v257_v0, %s775_s5  ;;  %340 = vrot.lane.b32.xlu1 %v257_v0, %s776_s7  ;;  %s777_s13 = smov 64   ;;  %v259_v1 = vsel %vm258_vm0, %v257_v0, 0.0  ;;  %s252_s6 = sld [smem:[#allocation3 + %s842_s25]]  ;;  %vm372_vm14 = vcmask 785408  }
  0x5b   : > { %s508_s26 = sshll.u32 %s842_s25, 3  ;;  %s250_s29 = scalar_lea.vmem [#allocation9], %s505_s23 }
  0x5c   : > { %s396_s28 = scalar_lea.hbm %s1080_s4, %s508_s26  ;;  %s398_s1 = sshll.u32 %s250_s29, 4  ;;  %s399_s1 = int_to_ptr.vmem [resolvable:$true] %s398_s1 }
  0x5d   : > { %s400_s30 = sshll.u32 %s396_s28, 4  ;;  %s386_s19 = scalar_lea.sflag [#allocation6], %s965_s18  ;;  %s401_s30 = int_to_ptr.hbm [resolvable:$true] %s400_s30 }
  0x60   : > { %p253_p6 = scmp.lt.s32.totalorder %s252_s6, 1 }
  0x62   : > { %311 = vrot.lane.b32.xlu0 %v257_v0, %s777_s13  ;;  %s1121_s6 = smov (!%p253_p6, %s252_s6), 1 }
  0x63   : > { %s255_s10 = scalar_lea.vmem %s1079_s3, %s1121_s6  ;;  %s696_s6 = scalar_lea.hbm %s1080_s4, 16 }
  0x8c   : > { %260 = vadd.xlane.f32.xlu0 %v259_v1 }
  0xcc   : > { %v283_v2 = vpop.permute.xlu0 %282  ;;  %v341_v6 = vpop.permute.xlu1 %340 }
  0xcd   : > { %v285_v3 = vsel %vm258_vm0, %v283_v2, 0.0  ;;  %v343_v7 = vsel %vm258_vm0, %v341_v6, 0.0 }
  0xce   : > { %286 = vadd.xlane.f32.xlu1 %v285_v3 }
  0xd4   : > { %v312_v4 = vpop.permute.xlu0 %311 }
  0xd5   : > { %v314_v5 = vsel %vm258_vm0, %v312_v4, 0.0 }
  0xd6   : > { %315 = vadd.xlane.f32.xlu2 %v314_v5 }
  0xde   : > { %344 = vadd.xlane.f32.xlu2 %v343_v7 }
  0xff   : > { %v261_v8 = vpop.xlane.xlu0 %260 }
 0x100   : > { %v262_v9 = vmul.f32 0.03125, %v261_v8 }
 0x102   : > { %v987_v10 = vsub.f32 %v257_v0, %v262_v9 }
 0x104   : > { %v264_v11 = vmul.f32 %v987_v10, %v987_v10 }
 0x106   : > { %v265_v12 = vsel %vm258_vm0, %v264_v11, 0.0 }
 0x107   : > { %266 = vadd.xlane.f32.xlu1 %v265_v12  ;;  %v594_v12 = vld [vmem:[%s976_s11] ss:$0 sm:$0xff]  ;;  %s690_s11 = sshra.s32 %s401_s30, 4  ;;  %s691_s11 = int_to_ptr.hbm [resolvable:$true] %s690_s11 }
 0x108   : > { %p697_p5 = scmp.lt.s32.totalorder %s691_s11, %s1080_s4 }
 0x141   : > { %v287_v13 = vpop.xlane.xlu1 %286 }
 0x142   : > { %v288_v14 = vmul.f32 0.03125, %v287_v13 }
 0x144   : > { %v992_v15 = vsub.f32 %v257_v0, %v288_v14 }
 0x146   : > { %v290_v16 = vmul.f32 %v992_v15, %v992_v15 }
 0x148   : > { %292 = vrot.lane.b32.xlu2 %v290_v16, %s775_s5  ;;  %s692_s5 = scalar_lea.hbm %s691_s11, 8 }
 0x149   : > { %v316_v17 = vpop.xlane.xlu2 %315  ;;  %p693_p12 = scmp.ne.s32.totalorder %s691_s11, %s692_s5  ;;  %p698_p4 = scmp.lt.s32.totalorder %s696_s6, %s692_s5 }
 0x14a   : > { %v317_v18 = vmul.f32 0.03125, %v316_v17 }
 0x14b   : > { %p694_p2 = pnand %p693_p12, %p877_p10  ;;  %p699_p9 = por %p698_p4, %p697_p5 }
 0x14c   : > { %v996_v19 = vsub.f32 %v257_v0, %v317_v18 }
 0x14d   : > { %p695_p8 = pneg %p694_p2 }
 0x14e   : > { %v319_v20 = vmul.f32 %v996_v19, %v996_v19 }
 0x14f   : > { %p700_p11 = pnand %p699_p9, %p695_p8 }
 0x150   : > { %321 = vrot.lane.b32.xlu2 %v319_v20, %s777_s13 }
 0x151   : > { %v345_v21 = vpop.xlane.xlu2 %344 }
 0x152   : > { %v346_v22 = vmul.f32 0.03125, %v345_v21 }
 0x154   : > { %v1000_v23 = vsub.f32 %v257_v0, %v346_v22 }
 0x156   : > { %v348_v24 = vmul.f32 %v1000_v23, %v1000_v23 }
 0x158   : > { %350 = vrot.lane.b32.xlu2 %v348_v24, %s776_s7 }
 0x17a   : > { %v267_v31 = vpop.xlane.xlu1 %266 }
 0x17b   : > { %v268_v32 = vmul.f32 0.03125, %v267_v31 }
 0x17d   : > { %v269_v33 = vadd.f32 1e-05, %v268_v32 }
 0x17f   : > { %596 = vrsqrt.f32 %v269_v33  ;;  %vm276_vm1 = vweird.f32 %v269_v33 }
 0x185   : > { %v597_v39 = vpop.eup %596 }
 0x186   : > { %v271_v43 = vmul.f32 %v597_v39, %v269_v33  ;;  %vm277_vm2 = vweird.f32 %v597_v39 }
 0x187   : > { %vm1015_vm5 = vmor %vm276_vm1, %vm277_vm2 }
 0x188   : > { %v272_v47 = vmul.f32 %v597_v39, %v271_v43 }
 0x18a   : > { %v273_v52 = vmul.f32 0.5, %v272_v47 }
 0x18c   : > { %v274_v56 = vsub.f32 1.5, %v273_v52 }
 0x18e   : > { %v275_v62 = vmul.f32 %v597_v39, %v274_v56 }
 0x190   : > { %v279_v4 = vsel %vm1015_vm5, %v597_v39, %v275_v62 }
 0x191   : > { %v280_v9 = vmul.f32 %v279_v4, %v987_v10  ;;  %v595_v10 = vld [vmem:[%s255_s10] ss:$0 sm:$0xff] }
 0x1a2   : > { %v293_v25 = vpop.permute.xlu2 %292 }
 0x1a3   : > { %v295_v26 = vsel %vm258_vm0, %v293_v25, 0.0 }
 0x1a4   : > { %296 = vadd.xlane.f32.xlu2 %v295_v26 }
 0x1aa   : > { %v322_v27 = vpop.permute.xlu2 %321 }
 0x1ab   : > { %v324_v28 = vsel %vm258_vm0, %v322_v27, 0.0 }
 0x1ac   : > { %325 = vadd.xlane.f32.xlu0 %v324_v28 }
 0x1b2   : > { %v351_v29 = vpop.permute.xlu2 %350 }
 0x1b3   : > { %v353_v30 = vsel %vm258_vm0, %v351_v29, 0.0 }
 0x1b4   : > { %354 = vadd.xlane.f32.xlu1 %v353_v30 }
 0x217   : > { %v297_v34 = vpop.xlane.xlu2 %296 }
 0x218   : > { %v298_v35 = vmul.f32 0.03125, %v297_v34 }
 0x21a   : > { %v299_v36 = vadd.f32 1e-05, %v298_v35 }
 0x21c   : > { %598 = vrsqrt.f32 %v299_v36  ;;  %vm306_vm6 = vweird.f32 %v299_v36 }
 0x21f   : > { %v326_v37 = vpop.xlane.xlu0 %325 }
 0x220   : > { %v327_v38 = vmul.f32 0.03125, %v326_v37 }
 0x222   : > { %v599_v40 = vpop.eup %598  ;;  %v328_v41 = vadd.f32 1e-05, %v327_v38 }
 0x223   : > { %v301_v42 = vmul.f32 %v599_v40, %v299_v36  ;;  %vm307_vm3 = vweird.f32 %v599_v40 }
 0x224   : > { %600 = vrsqrt.f32 %v328_v41  ;;  %vm308_vm7 = vmor %vm306_vm6, %vm307_vm3  ;;  %vm335_vm8 = vweird.f32 %v328_v41 }
 0x225   : > { %v302_v44 = vmul.f32 %v599_v40, %v301_v42 }
 0x227   : > { %v355_v45 = vpop.xlane.xlu1 %354  ;;  %v303_v50 = vmul.f32 0.5, %v302_v44 }
 0x228   : > { %v356_v46 = vmul.f32 0.03125, %v355_v45 }
 0x229   : > { %v304_v54 = vsub.f32 1.5, %v303_v50 }
 0x22a   : > { %v601_v48 = vpop.eup %600  ;;  %v357_v49 = vadd.f32 1e-05, %v356_v46 }
 0x22b   : > { %v330_v51 = vmul.f32 %v601_v48, %v328_v41  ;;  %v305_v59 = vmul.f32 %v599_v40, %v304_v54  ;;  %vm336_vm4 = vweird.f32 %v601_v48 }
 0x22c   : > { %602 = vrsqrt.f32 %v357_v49  ;;  %vm337_vm9 = vmor %vm335_vm8, %vm336_vm4  ;;  %vm364_vm11 = vweird.f32 %v357_v49 }
 0x22d   : > { %v331_v53 = vmul.f32 %v601_v48, %v330_v51  ;;  %v309_v1 = vsel %vm308_vm7, %v599_v40, %v305_v59 }
 0x22e   : > { %v310_v6 = vmul.f32 %v309_v1, %v992_v15 }
 0x22f   : > { %v332_v55 = vmul.f32 0.5, %v331_v53 }
 0x230   : > { %v369_v13 = vsel %vm258_vm0, %v280_v9, %v310_v6 }
 0x231   : > { %v333_v57 = vsub.f32 1.5, %v332_v55 }
 0x232   : > { %v603_v58 = vpop.eup %602 }
 0x233   : > { %v359_v60 = vmul.f32 %v603_v58, %v357_v49  ;;  %v334_v61 = vmul.f32 %v601_v48, %v333_v57  ;;  %vm365_vm10 = vweird.f32 %v603_v58 }
 0x234   : > { %vm366_vm13 = vmor %vm364_vm11, %vm365_vm10 }
 0x235   : > { %v360_v0 = vmul.f32 %v603_v58, %v359_v60  ;;  %v338_v3 = vsel %vm337_vm9, %v601_v48, %v334_v61 }
 0x236   : > { %v339_v7 = vmul.f32 %v338_v3, %v996_v19 }
 0x237   : > { %v361_v2 = vmul.f32 0.5, %v360_v0 }
 0x238   : > { %v371_v15 = vsel %vm370_vm12, %v369_v13, %v339_v7 }
 0x239   : > { %v362_v5 = vsub.f32 1.5, %v361_v2 }
 0x23b   : > { %v363_v8 = vmul.f32 %v603_v58, %v362_v5 }
 0x23d   : > { %v367_v11 = vsel %vm366_vm13, %v603_v58, %v363_v8 }
 0x23e   : > { %v368_v14 = vmul.f32 %v367_v11, %v1000_v23 }
 0x240   : > { %v373_v16 = vsel %vm372_vm14, %v371_v15, %v368_v14 }
 0x241   : > { %v379_v17 = vmul.f32 %v594_v12, %v373_v16 }
 0x243   : > { %v383_v18 = vadd.f32 %v595_v10, %v379_v17 }
 0x245   : > { %384 = vst [vmem:[%s250_s29] sm:$0xff] %v383_v18 }
 0x246   : > { %703 = shalt.err (!%p700_p11)
}
 0x247   : > { %517 = dma.vmem_to_hbm [thread:$0]  (%p877_p10), %s399_s1, 128, %s401_s30, %s386_s19  }
 0x248 PF: > { %s412_s18 = sand.u32 1, %s760_s22   ;;  %p1105_p3 = scmp.ne.s32.totalorder %s1091_s9, 0 }
 0x249   : > { %p1106_p7 = scmp.ge.s32.totalorder %s772_s24, 2  ;;  %s413_s14 = scalar_lea.sflag [#allocation6], %s412_s18 }
 0x24b   : > { %p529_p13 = pnand %p1106_p7, %p1105_p3 }
 0x24d   : > { %p530_p0 = pneg %p529_p13 }
 0x24f   : > { %743 = dma.done.wait (%p530_p0), %s413_s14, 128  }
 0x250   : > { %745 = vsyncadd (%p530_p0), %s413_s14, 4294967168  ;;  %s1107_s10 = sld [smem:[#allocation18_spill]]  ;;  %p28_p10 = scmp.ge.s32.totalorder %s846_s27, 4  }
 0x251   : > { %s1108_s26 = sld [smem:[#allocation16_spill]]  ;;  %s1110_s19 = smov %s752_s20 }
 0x252   : > { %s1109_s23 = sld [smem:[#allocation17_spill]]  ;;  %s1111_s20 = smov %s756_s21 }
 0x253   : > { %s1113_s22 = smov %s764_s0  ;;  %s1115_s24 = smov %s846_s27 }
 0x254   :  { %30 = sbr.rel (!%p28_p10) target bundleno = 15 (0xf), region = 93 }
 0x256   : > { %s1112_s21 = smov %s1107_s10 }
 0x257   : > { %s1114_s0 = smov %s1108_s26 }
 0x259   :  { %419 = vsyncpa [#allocation5], 1 }
 0x25a   :  { %421 = vsyncpa [#allocation5 + $0x1], 1 }
 0x25b   :  { %422 = vsyncpa [#allocation8], 1 }
 0x25c   :  { %424 = vsyncpa [#allocation8 + $0x1], 1 }
 0x25d   :  { %425 = vsyncpa [#allocation6], 1 }
 0x25e   :  { %427 = vsyncpa [#allocation6 + $0x1], 1 }

</bundles_post_ra>
